<compile_context>
chip_gen: v7x
topology: tpu7x:2x2x1
jax: 0.10.0
libtpu: 0.0.40
codegen_flags: <defaults>
</compile_context>

<pallas_src>
import math

import jax
import jax.numpy as jnp
from jax.experimental import pallas as pl
from jax.experimental.pallas import tpu as pltpu

LANE = 128


def make_mlp_kernel(num_layers):
    """Fused MLP: all layers computed in one VMEM-resident pass per batch tile.

    Refs, in order: x, (W1, b1), (W2, b2), ..., out
    Weights are (in, out) bf16; biases are (1, out) f32.
    ReLU after every layer except the last (matches the torch.nn.Sequential build).
    The last layer's out width is padded to a multiple of 128 -> lane-dense store.
    """

    def kernel(*refs):
        x_ref = refs[0]
        o_ref = refs[-1]
        # Single x -> bf16 cast before the layer loop (v5e has no bf16 VPU, so
        # extra casts cost VALU slots; harmless on v6e/v7x).
        h = x_ref[...].astype(jnp.bfloat16)
        for layer in range(num_layers):
            w_ref = refs[1 + 2 * layer]   # (in, out) bf16, VMEM resident
            b_ref = refs[2 + 2 * layer]   # (1, out) f32
            acc = jnp.dot(h, w_ref[...], preferred_element_type=jnp.float32)
            acc = acc + b_ref[...]
            if layer != num_layers - 1:
                # ReLU in f32, then the unavoidable recast for the next MXU pass.
                h = jnp.maximum(acc, 0.0).astype(jnp.bfloat16)
            else:
                # Lane-dense (padded-to-128) unmasked full-lane store.
                o_ref[...] = acc.astype(o_ref.dtype)

    return kernel


def init_params(key, units_per_layer):
    """Deterministic PyTorch-style init: U(-1/sqrt(fan_in), 1/sqrt(fan_in)).

    Stored in PyTorch convention: W is (out, in), b is (out,).
    """
    params = []
    for layer_i in range(len(units_per_layer) - 1):
        fan_in = units_per_layer[layer_i]
        fan_out = units_per_layer[layer_i + 1]
        key, kw, kb = jax.random.split(key, 3)
        bound = 1.0 / math.sqrt(fan_in)
        w = jax.random.uniform(kw, (fan_out, fan_in), jnp.float32, -bound, bound)
        b = jax.random.uniform(kb, (fan_out,), jnp.float32, -bound, bound)
        params.append((w, b))
    return params


def prepare_params(params):
    """One-time layout prep (NOT on the per-call path).

    Transpose W to (in, out), cast to bf16; reshape b to (1, out), keep f32.
    The LAST layer's out width is zero-padded to a multiple of 128 so the kernel's
    output store is lane-dense.  Returns (prepared_params, true_out_dim).
    """
    prepared = []
    n = len(params)
    out_dim = int(params[-1][0].shape[0])
    for i, (w, b) in enumerate(params):
        wt = jnp.asarray(w.T, dtype=jnp.bfloat16)            # (in, out)
        bb = jnp.asarray(b.reshape(1, -1), dtype=jnp.float32)  # (1, out)
        if i == n - 1:
            padded_out = pl.cdiv(wt.shape[1], LANE) * LANE
            pad = padded_out - wt.shape[1]
            if pad:
                wt = jnp.pad(wt, ((0, 0), (0, pad)))
                bb = jnp.pad(bb, ((0, 0), (0, pad)))
        prepared.append((wt, bb))
    return prepared, out_dim


def _choose_batch_tiling(batch):
    """Pick (batch_tile, padded_batch).

    * Round batch to a multiple of 8 (sublane granularity) instead of a power of
      two -> avoids up to ~2x padded-compute waste.
    * Per-tile I/O for this geometry is tiny, so per-grid-step overhead dominates:
      prefer very large tiles (cap 2048 rows keeps VMEM sane for huge batches).
    * When the padded batch >= 256, use (at least) two grid steps so the
      "parallel" batch axis can shard across v7x's two TensorCores.
    """
    rounded = pl.cdiv(max(batch, 8), 8) * 8
    cap = 2048
    if rounded >= 256:
        tb = min(pl.cdiv(rounded, 2 * 8) * 8, cap)
    else:
        tb = rounded
    padded_batch = pl.cdiv(rounded, tb) * tb
    return tb, padded_batch


def _vmem_capacity_bytes():
    try:
        return int(pltpu.get_tpu_info().vmem_capacity_bytes)
    except Exception:
        return 64 << 20  # conservative fallback: v7x per-TC VMEM


def torch_model_forward(feature_mat, prepared, out_dim):
    """Pallas equivalent of TorchModel.forward(feature_mat).

    feature_mat: (batch, in_dim) f32
    prepared:    output of prepare_params (bf16 (in,out) weights, f32 (1,out) biases,
                 last layer padded to a lane-dense out width)
    out_dim:     true output width (the kernel output is sliced back to it)
    """
    num_layers = len(prepared)
    batch, in_dim = feature_mat.shape
    padded_out = prepared[-1][0].shape[1]
    units = [in_dim] + [w.shape[1] for w, _ in prepared]

    # --- batch tiling / padding ---
    tb, padded_batch = _choose_batch_tiling(batch)
    x = feature_mat
    if padded_batch != batch:
        x = jnp.pad(x, ((0, padded_batch - batch), (0, 0)))
    grid = (padded_batch // tb,)

    # --- flat arg list: x, W1, b1, W2, b2, ... ---
    flat_args = [x]
    for w, b in prepared:
        flat_args.append(w)
        flat_args.append(b)

    param_bytes = sum(int(w.size) * w.dtype.itemsize + int(b.size) * b.dtype.itemsize
                      for w, b in prepared)
    vmem_cap = _vmem_capacity_bytes()
    # TODO(synk): when param_bytes exceeds ~40% of VMEM (trigger at half that size
    # on v7x's 64 MiB), stream weight chunks over a layer/K grid axis
    # (pltpu.emit_pipeline) instead of keeping everything resident.  Never hit at
    # this geometry, so the all-resident path is used unconditionally here.

    # --- cost hint for XLA's scheduler ---
    flops = 2 * padded_batch * sum(units[i] * units[i + 1] for i in range(num_layers))
    bytes_accessed = padded_batch * (in_dim + padded_out) * 4 + param_bytes
    cost = pl.CostEstimate(flops=flops, transcendentals=0,
                           bytes_accessed=bytes_accessed)

    def build_and_run(param_buffers):
        in_specs = [pl.BlockSpec((tb, in_dim), lambda i: (i, 0))]
        for w, b in prepared:
            if param_buffers == 1:
                # Constant index_map => fetched once; single-buffer to halve the
                # resident-param VMEM (matters most on v7x's 64 MiB).
                in_specs.append(pl.BlockSpec(w.shape, lambda i: (0, 0),
                                             pipeline_mode=pl.Buffered(1)))
                in_specs.append(pl.BlockSpec(b.shape, lambda i: (0, 0),
                                             pipeline_mode=pl.Buffered(1)))
            else:
                in_specs.append(pl.BlockSpec(w.shape, lambda i: (0, 0)))
                in_specs.append(pl.BlockSpec(b.shape, lambda i: (0, 0)))
        out_specs = pl.BlockSpec((tb, padded_out), lambda i: (i, 0))

        # VMEM budget: double-buffered x/out tiles + resident params + live h.
        io_bytes = 2 * tb * in_dim * 4 + 2 * tb * padded_out * 4
        act_bytes = 2 * tb * max(units) * 4
        need = io_bytes + param_buffers * param_bytes + act_bytes
        vmem_limit = max(16 << 20,
                         min(int(1.5 * need) + (4 << 20), int(0.8 * vmem_cap)))

        out = pl.pallas_call(
            make_mlp_kernel(num_layers),
            out_shape=jax.ShapeDtypeStruct((padded_batch, padded_out), jnp.float32),
            grid=grid,
            in_specs=in_specs,
            out_specs=out_specs,
            compiler_params=pltpu.CompilerParams(
                dimension_semantics=("parallel",),
                vmem_limit_bytes=vmem_limit,
            ),
            cost_estimate=cost,
        )(*flat_args)
        return jax.block_until_ready(out)

    try:
        out = build_and_run(param_buffers=1)
    except Exception:
        # pl.Buffered(1) is a perf hint; if this JAX build rejects it, fall back
        # to the (previously validated) default double-buffered spec.
        out = build_and_run(param_buffers=2)

    return out[:batch, :out_dim]


def matched_reference(feature_mat, prepared, out_dim):
    """Pure-JAX reference matching the kernel's numerics (bf16 dot, f32 accum)."""
    h = feature_mat.astype(jnp.bfloat16)
    out = None
    for i, (w, b) in enumerate(prepared):
        acc = jnp.dot(h, w, preferred_element_type=jnp.float32) + b[0]
        if i != len(prepared) - 1:
            h = jnp.maximum(acc, 0.0).astype(jnp.bfloat16)
        else:
            out = acc
    return out[:, :out_dim]


def reference_forward_f32(feature_mat, params):
    """Pure-f32 reference with PyTorch semantics (Linear + ReLU between hidden)."""
    h = feature_mat
    for i, (w, b) in enumerate(params):
        h = h @ w.T + b
        if i != len(params) - 1:
            h = jnp.maximum(h, 0.0)
    return h


def _check(batch, units_per_layer, key):
    key, kx, kp = jax.random.split(key, 3)
    feature_mat = jax.random.normal(kx, (batch, units_per_layer[0]), jnp.float32)
    params = init_params(kp, units_per_layer)            # PyTorch (out,in) layout
    prepared, out_dim = prepare_params(params)           # one-time bf16/pad prep

    out = torch_model_forward(feature_mat, prepared, out_dim)
    out = jax.block_until_ready(out)
    assert out.shape == (batch, units_per_layer[-1])

    # Exact-numerics check vs a reference that mirrors the kernel (bf16/f32 mix).
    ref_matched = matched_reference(feature_mat, prepared, out_dim)
    assert jnp.allclose(out, ref_matched, atol=1e-4, rtol=1e-4), \
        "mismatch vs bf16-matched reference"

    # Semantics check vs the full-f32 PyTorch-style forward (bf16 rounding slack).
    ref_f32 = reference_forward_f32(feature_mat, params)
    assert jnp.allclose(out, ref_f32, atol=5e-2, rtol=5e-2), \
        "mismatch vs f32 reference beyond bf16 tolerance"
    return key


if __name__ == "__main__":
    units_per_layer = [32, 64, 32, 4]
    key = jax.random.PRNGKey(0)

    # Small batch (single grid step, tb = 8).
    key = _check(8, units_per_layer, key)
    # Larger non-pow2 batch (exercises row padding + the 2-step "parallel" grid).
    key = _check(300, units_per_layer, key)

    print("KERNEL_OK")
</pallas_src>

<mosaic_0001>
module attributes {stable_mosaic.version = 11 : i64} {
  func.func @kernel(%arg0: i32, %arg1: memref<8x32xf32, #tpu.memory_space<vmem>>, %arg2: memref<32x64xbf16, #tpu.memory_space<vmem>>, %arg3: memref<1x64xf32, #tpu.memory_space<vmem>>, %arg4: memref<64x32xbf16, #tpu.memory_space<vmem>>, %arg5: memref<1x32xf32, #tpu.memory_space<vmem>>, %arg6: memref<32x128xbf16, #tpu.memory_space<vmem>>, %arg7: memref<1x128xf32, #tpu.memory_space<vmem>>, %arg8: memref<8x128xf32, #tpu.memory_space<vmem>>) attributes {dimension_semantics = [#tpu.dimension_semantics<parallel>], iteration_bounds = array<i64: 1>, scalar_prefetch = 0 : i64, scratch_operands = 0 : i64, tpu.core_type = #tpu.core_type<tc>, window_params = [{transform_indices = @transform_0, window_bounds = array<i64: 8, 32>}, {pipeline_mode = #tpu.pipeline_mode<synchronous>, transform_indices = @transform_1, window_bounds = array<i64: 32, 64>}, {pipeline_mode = #tpu.pipeline_mode<synchronous>, transform_indices = @transform_2, window_bounds = array<i64: 1, 64>}, {pipeline_mode = #tpu.pipeline_mode<synchronous>, transform_indices = @transform_3, window_bounds = array<i64: 64, 32>}, {pipeline_mode = #tpu.pipeline_mode<synchronous>, transform_indices = @transform_4, window_bounds = array<i64: 1, 32>}, {pipeline_mode = #tpu.pipeline_mode<synchronous>, transform_indices = @transform_5, window_bounds = array<i64: 32, 128>}, {pipeline_mode = #tpu.pipeline_mode<synchronous>, transform_indices = @transform_6, window_bounds = array<i64: 1, 128>}, {transform_indices = @transform_7, window_bounds = array<i64: 8, 128>}]} {
    %c0 = arith.constant 0 : index
    %c0_0 = arith.constant 0 : index
    %0 = vector.load %arg1[%c0, %c0_0] : memref<8x32xf32, #tpu.memory_space<vmem>>, vector<8x32xf32>
    %1 = arith.truncf %0 : vector<8x32xf32> to vector<8x32xbf16>
    %c0_1 = arith.constant 0 : index
    %c0_2 = arith.constant 0 : index
    %2 = vector.load %arg2[%c0_1, %c0_2] : memref<32x64xbf16, #tpu.memory_space<vmem>>, vector<32x64xbf16>
    %cst = arith.constant dense<0.000000e+00> : vector<8x64xf32>
    %3 = tpu.matmul %1, %2, %cst {dimension_numbers = #tpu.dot_dimension_numbers<[1], [0], [0], [1], [0, 0, 1, 1], [], []>} : vector<8x32xbf16>, vector<32x64xbf16>, vector<8x64xf32> -> vector<8x64xf32>
    %c0_3 = arith.constant 0 : index
    %c0_4 = arith.constant 0 : index
    %4 = vector.load %arg3[%c0_3, %c0_4] : memref<1x64xf32, #tpu.memory_space<vmem>>, vector<1x64xf32>
    %5 = vector.broadcast %4 : vector<1x64xf32> to vector<8x64xf32>
    %6 = arith.addf %3, %5 : vector<8x64xf32>
    %cst_5 = arith.constant 0.000000e+00 : f32
    %7 = vector.broadcast %cst_5 : f32 to vector<8x64xf32>
    %8 = arith.maximumf %6, %7 : vector<8x64xf32>
    %9 = arith.truncf %8 : vector<8x64xf32> to vector<8x64xbf16>
    %c0_6 = arith.constant 0 : index
    %c0_7 = arith.constant 0 : index
    %10 = vector.load %arg4[%c0_6, %c0_7] : memref<64x32xbf16, #tpu.memory_space<vmem>>, vector<64x32xbf16>
    %cst_8 = arith.constant dense<0.000000e+00> : vector<8x32xf32>
    %11 = tpu.matmul %9, %10, %cst_8 {dimension_numbers = #tpu.dot_dimension_numbers<[1], [0], [0], [1], [0, 0, 1, 1], [], []>} : vector<8x64xbf16>, vector<64x32xbf16>, vector<8x32xf32> -> vector<8x32xf32>
    %c0_9 = arith.constant 0 : index
    %c0_10 = arith.constant 0 : index
    %12 = vector.load %arg5[%c0_9, %c0_10] : memref<1x32xf32, #tpu.memory_space<vmem>>, vector<1x32xf32>
    %13 = vector.broadcast %12 : vector<1x32xf32> to vector<8x32xf32>
    %14 = arith.addf %11, %13 : vector<8x32xf32>
    %cst_11 = arith.constant 0.000000e+00 : f32
    %15 = vector.broadcast %cst_11 : f32 to vector<8x32xf32>
    %16 = arith.maximumf %14, %15 : vector<8x32xf32>
    %17 = arith.truncf %16 : vector<8x32xf32> to vector<8x32xbf16>
    %c0_12 = arith.constant 0 : index
    %c0_13 = arith.constant 0 : index
    %18 = vector.load %arg6[%c0_12, %c0_13] : memref<32x128xbf16, #tpu.memory_space<vmem>>, vector<32x128xbf16>
    %cst_14 = arith.constant dense<0.000000e+00> : vector<8x128xf32>
    %19 = tpu.matmul %17, %18, %cst_14 {dimension_numbers = #tpu.dot_dimension_numbers<[1], [0], [0], [1], [0, 0, 1, 1], [], []>} : vector<8x32xbf16>, vector<32x128xbf16>, vector<8x128xf32> -> vector<8x128xf32>
    %c0_15 = arith.constant 0 : index
    %c0_16 = arith.constant 0 : index
    %20 = vector.load %arg7[%c0_15, %c0_16] : memref<1x128xf32, #tpu.memory_space<vmem>>, vector<1x128xf32>
    %21 = vector.broadcast %20 : vector<1x128xf32> to vector<8x128xf32>
    %22 = arith.addf %19, %21 : vector<8x128xf32>
    %c0_17 = arith.constant 0 : index
    %c0_18 = arith.constant 0 : index
    %23 = vector.load %arg8[%c0_17, %c0_18] : memref<8x128xf32, #tpu.memory_space<vmem>>, vector<8x128xf32>
    tpu.vector_store %arg8[%c0_17, %c0_18], %22 {strides = array<i32>} : memref<8x128xf32, #tpu.memory_space<vmem>>, vector<8x128xf32>,
    return
  }
  func.func @transform_0(%arg0: i32) -> (i32, i32) {
    %c0_i32 = arith.constant 0 : i32
    %c0_i32_0 = arith.constant 0 : i32
    return %arg0, %c0_i32 : i32, i32
  }
  func.func @transform_1(%arg0: i32) -> (i32, i32) {
    %c0_i32 = arith.constant 0 : i32
    %c0_i32_0 = arith.constant 0 : i32
    %c0_i32_1 = arith.constant 0 : i32
    return %c0_i32, %c0_i32_0 : i32, i32
  }
  func.func @transform_2(%arg0: i32) -> (i32, i32) {
    %c0_i32 = arith.constant 0 : i32
    %c0_i32_0 = arith.constant 0 : i32
    %c0_i32_1 = arith.constant 0 : i32
    return %c0_i32, %c0_i32_0 : i32, i32
  }
  func.func @transform_3(%arg0: i32) -> (i32, i32) {
    %c0_i32 = arith.constant 0 : i32
    %c0_i32_0 = arith.constant 0 : i32
    %c0_i32_1 = arith.constant 0 : i32
    return %c0_i32, %c0_i32_0 : i32, i32
  }
  func.func @transform_4(%arg0: i32) -> (i32, i32) {
    %c0_i32 = arith.constant 0 : i32
    %c0_i32_0 = arith.constant 0 : i32
    %c0_i32_1 = arith.constant 0 : i32
    return %c0_i32, %c0_i32_0 : i32, i32
  }
  func.func @transform_5(%arg0: i32) -> (i32, i32) {
    %c0_i32 = arith.constant 0 : i32
    %c0_i32_0 = arith.constant 0 : i32
    %c0_i32_1 = arith.constant 0 : i32
    return %c0_i32, %c0_i32_0 : i32, i32
  }
  func.func @transform_6(%arg0: i32) -> (i32, i32) {
    %c0_i32 = arith.constant 0 : i32
    %c0_i32_0 = arith.constant 0 : i32
    %c0_i32_1 = arith.constant 0 : i32
    return %c0_i32, %c0_i32_0 : i32, i32
  }
  func.func @transform_7(%arg0: i32) -> (i32, i32) {
    %c0_i32 = arith.constant 0 : i32
    %c0_i32_0 = arith.constant 0 : i32
    return %arg0, %c0_i32 : i32, i32
  }
}

module attributes {stable_mosaic.version = 11 : i64} {
  func.func @kernel(%arg0: i32, %arg1: memref<8x32xf32, #tpu.memory_space<vmem>>, %arg2: memref<32x64xbf16, #tpu.memory_space<vmem>>, %arg3: memref<1x64xf32, #tpu.memory_space<vmem>>, %arg4: memref<64x32xbf16, #tpu.memory_space<vmem>>, %arg5: memref<1x32xf32, #tpu.memory_space<vmem>>, %arg6: memref<32x128xbf16, #tpu.memory_space<vmem>>, %arg7: memref<1x128xf32, #tpu.memory_space<vmem>>, %arg8: memref<8x128xf32, #tpu.memory_space<vmem>>) attributes {dimension_semantics = [#tpu.dimension_semantics<parallel>], iteration_bounds = array<i64: 1>, scalar_prefetch = 0 : i64, scratch_operands = 0 : i64, tpu.core_type = #tpu.core_type<tc>, window_params = [{transform_indices = @transform_0, window_bounds = array<i64: 8, 32>}, {pipeline_mode = #tpu.pipeline_mode<synchronous>, transform_indices = @transform_1, window_bounds = array<i64: 32, 64>}, {pipeline_mode = #tpu.pipeline_mode<synchronous>, transform_indices = @transform_2, window_bounds = array<i64: 1, 64>}, {pipeline_mode = #tpu.pipeline_mode<synchronous>, transform_indices = @transform_3, window_bounds = array<i64: 64, 32>}, {pipeline_mode = #tpu.pipeline_mode<synchronous>, transform_indices = @transform_4, window_bounds = array<i64: 1, 32>}, {pipeline_mode = #tpu.pipeline_mode<synchronous>, transform_indices = @transform_5, window_bounds = array<i64: 32, 128>}, {pipeline_mode = #tpu.pipeline_mode<synchronous>, transform_indices = @transform_6, window_bounds = array<i64: 1, 128>}, {transform_indices = @transform_7, window_bounds = array<i64: 8, 128>}]} {
    %c0 = arith.constant 0 : index
    %c0_0 = arith.constant 0 : index
    %0 = vector.load %arg1[%c0, %c0_0] : memref<8x32xf32, #tpu.memory_space<vmem>>, vector<8x32xf32>
    %1 = arith.truncf %0 : vector<8x32xf32> to vector<8x32xbf16>
    %c0_1 = arith.constant 0 : index
    %c0_2 = arith.constant 0 : index
    %2 = vector.load %arg2[%c0_1, %c0_2] : memref<32x64xbf16, #tpu.memory_space<vmem>>, vector<32x64xbf16>
    %cst = arith.constant dense<0.000000e+00> : vector<8x64xf32>
    %3 = tpu.matmul %1, %2, %cst {dimension_numbers = #tpu.dot_dimension_numbers<[1], [0], [0], [1], [0, 0, 1, 1], [], []>} : vector<8x32xbf16>, vector<32x64xbf16>, vector<8x64xf32> -> vector<8x64xf32>
    %c0_3 = arith.constant 0 : index
    %c0_4 = arith.constant 0 : index
    %4 = vector.load %arg3[%c0_3, %c0_4] : memref<1x64xf32, #tpu.memory_space<vmem>>, vector<1x64xf32>
    %5 = vector.broadcast %4 : vector<1x64xf32> to vector<8x64xf32>
    %6 = arith.addf %3, %5 : vector<8x64xf32>
    %cst_5 = arith.constant 0.000000e+00 : f32
    %7 = vector.broadcast %cst_5 : f32 to vector<8x64xf32>
    %8 = arith.maximumf %6, %7 : vector<8x64xf32>
    %9 = arith.truncf %8 : vector<8x64xf32> to vector<8x64xbf16>
    %c0_6 = arith.constant 0 : index
    %c0_7 = arith.constant 0 : index
    %10 = vector.load %arg4[%c0_6, %c0_7] : memref<64x32xbf16, #tpu.memory_space<vmem>>, vector<64x32xbf16>
    %cst_8 = arith.constant dense<0.000000e+00> : vector<8x32xf32>
    %11 = tpu.matmul %9, %10, %cst_8 {dimension_numbers = #tpu.dot_dimension_numbers<[1], [0], [0], [1], [0, 0, 1, 1], [], []>} : vector<8x64xbf16>, vector<64x32xbf16>, vector<8x32xf32> -> vector<8x32xf32>
    %c0_9 = arith.constant 0 : index
    %c0_10 = arith.constant 0 : index
    %12 = vector.load %arg5[%c0_9, %c0_10] : memref<1x32xf32, #tpu.memory_space<vmem>>, vector<1x32xf32>
    %13 = vector.broadcast %12 : vector<1x32xf32> to vector<8x32xf32>
    %14 = arith.addf %11, %13 : vector<8x32xf32>
    %cst_11 = arith.constant 0.000000e+00 : f32
    %15 = vector.broadcast %cst_11 : f32 to vector<8x32xf32>
    %16 = arith.maximumf %14, %15 : vector<8x32xf32>
    %17 = arith.truncf %16 : vector<8x32xf32> to vector<8x32xbf16>
    %c0_12 = arith.constant 0 : index
    %c0_13 = arith.constant 0 : index
    %18 = vector.load %arg6[%c0_12, %c0_13] : memref<32x128xbf16, #tpu.memory_space<vmem>>, vector<32x128xbf16>
    %cst_14 = arith.constant dense<0.000000e+00> : vector<8x128xf32>
    %19 = tpu.matmul %17, %18, %cst_14 {dimension_numbers = #tpu.dot_dimension_numbers<[1], [0], [0], [1], [0, 0, 1, 1], [], []>} : vector<8x32xbf16>, vector<32x128xbf16>, vector<8x128xf32> -> vector<8x128xf32>
    %c0_15 = arith.constant 0 : index
    %c0_16 = arith.constant 0 : index
    %20 = vector.load %arg7[%c0_15, %c0_16] : memref<1x128xf32, #tpu.memory_space<vmem>>, vector<1x128xf32>
    %21 = vector.broadcast %20 : vector<1x128xf32> to vector<8x128xf32>
    %22 = arith.addf %19, %21 : vector<8x128xf32>
    %c0_17 = arith.constant 0 : index
    %c0_18 = arith.constant 0 : index
    %23 = vector.load %arg8[%c0_17, %c0_18] : memref<8x128xf32, #tpu.memory_space<vmem>>, vector<8x128xf32>
    tpu.vector_store %arg8[%c0_17, %c0_18], %22 {strides = array<i32>} : memref<8x128xf32, #tpu.memory_space<vmem>>, vector<8x128xf32>,
    return
  }
  func.func @transform_0(%arg0: i32) -> (i32, i32) {
    %c0_i32 = arith.constant 0 : i32
    %c0_i32_0 = arith.constant 0 : i32
    return %arg0, %c0_i32 : i32, i32
  }
  func.func @transform_1(%arg0: i32) -> (i32, i32) {
    %c0_i32 = arith.constant 0 : i32
    %c0_i32_0 = arith.constant 0 : i32
    %c0_i32_1 = arith.constant 0 : i32
    return %c0_i32, %c0_i32_0 : i32, i32
  }
  func.func @transform_2(%arg0: i32) -> (i32, i32) {
    %c0_i32 = arith.constant 0 : i32
    %c0_i32_0 = arith.constant 0 : i32
    %c0_i32_1 = arith.constant 0 : i32
    return %c0_i32, %c0_i32_0 : i32, i32
  }
  func.func @transform_3(%arg0: i32) -> (i32, i32) {
    %c0_i32 = arith.constant 0 : i32
    %c0_i32_0 = arith.constant 0 : i32
    %c0_i32_1 = arith.constant 0 : i32
    return %c0_i32, %c0_i32_0 : i32, i32
  }
  func.func @transform_4(%arg0: i32) -> (i32, i32) {
    %c0_i32 = arith.constant 0 : i32
    %c0_i32_0 = arith.constant 0 : i32
    %c0_i32_1 = arith.constant 0 : i32
    return %c0_i32, %c0_i32_0 : i32, i32
  }
  func.func @transform_5(%arg0: i32) -> (i32, i32) {
    %c0_i32 = arith.constant 0 : i32
    %c0_i32_0 = arith.constant 0 : i32
    %c0_i32_1 = arith.constant 0 : i32
    return %c0_i32, %c0_i32_0 : i32, i32
  }
  func.func @transform_6(%arg0: i32) -> (i32, i32) {
    %c0_i32 = arith.constant 0 : i32
    %c0_i32_0 = arith.constant 0 : i32
    %c0_i32_1 = arith.constant 0 : i32
    return %c0_i32, %c0_i32_0 : i32, i32
  }
  func.func @transform_7(%arg0: i32) -> (i32, i32) {
    %c0_i32 = arith.constant 0 : i32
    %c0_i32_0 = arith.constant 0 : i32
    return %arg0, %c0_i32 : i32, i32
  }
}

</mosaic_0001>

<bundles_post_ra>
// kernel: tpu_custom_call.1
= control target key start
LH: loop header
LB: loop body
LE: loop exit
PB: predicated region body
PF: predicated region fallthrough
CT: control target
= control target key end

     0   :  { %v353_v1 = vmov 0.0   ;;  %vm354_vm0 = vmmov 0   ;;  %vm53_vm1 = vcmask 261120   ;;  %s449_s0 = inlined_call_operand.vmem [shape: f32[8,32], index: 0, kind: input, shape index: {}]   ;;  %s450_s1 = inlined_call_operand.vmem [shape: bf16[32,64], index: 1, kind: input, shape index: {}]   ;;  %s451_s2 = inlined_call_operand.vmem [shape: f32[1,64], index: 2, kind: input, shape index: {}]   ;;  %s452_s3 = inlined_call_operand.vmem [shape: bf16[64,32], index: 3, kind: input, shape index: {}]   ;;  %s453_s4 = inlined_call_operand.vmem [shape: f32[1,32], index: 4, kind: input, shape index: {}]   ;;  %s454_s5 = inlined_call_operand.vmem [shape: bf16[32,128], index: 5, kind: input, shape index: {}]   ;;  %s455_s6 = inlined_call_operand.vmem [shape: f32[1,128], index: 6, kind: input, shape index: {}]   ;;  %s456_s7 = inlined_call_operand.hbm [shape: f32[8,128], index: 7, kind: output, shape index: {}]  }
   0x1   :  { %v321_v0 = vld [vmem:[%s450_s1] sm:$0xff]   ;;  %290 = vmatprep.subr.bf16.mxu0 %v353_v1  ;;  %v322_v2 = vld [vmem:[%s450_s1 + $0x8] sm:$0xff]   ;;  %298 = vmatprep.subr.bf16.mxu1 %v353_v1 }
   0x2   :  { %291 = vmatpush3.bf16.msra.mxu0 %v321_v0  ;;  %294 = vmatprep.mubr.msk.bf16.mxu0 %vm354_vm0, %v353_v1  ;;  %v28_v3 = vld [vmem:[%s449_s0] sm:$0xff]  ;;  %v324_v5 = vld [vmem:[%s452_s3 + $0x8] sm:$0xff]  }
   0x3   :  { %292 = vmatprep.subr.bf16.mxu0 %v353_v1  ;;  %v323_v4 = vld [vmem:[%s452_s3] sm:$0xff]   ;;  %306 = vmatprep.mubr.msk.bf16.mxu1 %vm354_vm0, %v353_v1  ;;  %v29_v6 = vpack.c.bf16 %v28_v3, %v28_v3 }
   0x4   :  { %299 = vmatpush3.bf16.msra.mxu1 %v323_v4 }
   0x5   :  { %300 = vmatprep.subr.bf16.mxu1 %v353_v1 }
   0x6   :  { %293 = vmatpush3.bf16.msra.mxu0 %v322_v2 }
   0x7   :  { %310 = vmatprep.subr.bf16.mxu0 %v353_v1 }
   0x8   :  { %12 = vsyncpa [#allocation3], 0  ;;  %301 = vmatpush3.bf16.msra.mxu1 %v324_v5  ;;  %v325_v7 = vld [vmem:[%s452_s3 + $0x10] sm:$0xff]   ;;  %v326_v8 = vld [vmem:[%s452_s3 + $0x18] sm:$0xff]   ;;  %vm138_vm2 = vcmask 523264   ;;  %s355_s21 = smov [#allocation2]  }
   0x9   :  { %295 = vmatmul.mubr.msk.bf16.vlgmr.msra.gmra.mrb[0].mxu0 %vm53_vm1, %v29_v6  ;;  %302 = vmatprep.subr.bf16.mxu1 %v353_v1  ;;  %v327_v9 = vld [vmem:[%s454_s5] sm:$0xff]   ;;  %v328_v18 = vld [vmem:[%s454_s5 + $0x8] sm:$0xff]   ;;  %s257_s5 = sshll.u32 %s355_s21, 4  ;;  %s258_s5 = int_to_ptr.vmem [resolvable:$true] %s257_s5 }
   0xa   :  { %314 = vmatprep.mubr.msk.bf16.mxu0 %vm354_vm0, %v353_v1  ;;  %311 = vmatpush3.bf16.msra.mxu0 %v327_v9  ;;  %v265_v10 = vld [vmem:[%s451_s2] ss:$0 sm:$0xff]  ;;  %p334_p1 = scmp.lt.s32.totalorder %s258_s5, %s258_s5 }
   0xb   :  { %312 = vmatprep.subr.bf16.mxu0 %v353_v1  ;;  %v269_v19 = vld [vmem:[%s453_s4] ss:$0 sm:$0xff]  ;;  %s329_s4 = scalar_lea.vmem %s258_s5, 128 }
   0xc   :  { %303 = vmatpush3.bf16.msra.mxu1 %v325_v7  ;;  %v275_v27 = vld [vmem:[%s455_s6] ss:$0 sm:$0xff]  ;;  %p330_p0 = scmp.ne.s32.totalorder %s258_s5, %s329_s4  ;;  %p335_p2 = scmp.lt.s32.totalorder %s329_s4, %s329_s4 }
   0xd   :  { %304 = vmatprep.subr.bf16.mxu1 %v353_v1 }
   0xe   :  { %313 = vmatpush3.bf16.msra.mxu0 %v328_v18  ;;  %p336_p3 = por %p335_p2, %p334_p1 }
  0x10   :  { %305 = vmatpush3.bf16.msra.mxu1 %v326_v8  ;;  %p337_p4 = pnand %p336_p3, %p330_p0 }
  0xdc   :  { %v91_v11 = vpop.f32.mrb[0].mxu0 }
  0xdd   :  { %v92_v12 = vadd.f32 %v265_v10, %v91_v11  ;;  %v296_v13 = vpop.f32.mrb[1].mxu0 }
  0xde   :  { %v94_v14 = vpop.f32.mrb[2].mxu0 }
  0xdf   :  { %v97_v15 = vmax.f32 %v92_v12, 0.0  ;;  %v297_v16 = vpop.f32.mrb[3].mxu0 }
  0xe1   :  { %v98_v17 = vpack.c.bf16 %v97_v15, %v97_v15 }
  0xe3   :  { %307 = vmatmul.mubr.msk.bf16.vlgmr.msra.gmra.mrb[0].mxu1 %vm138_vm2, %v98_v17 }
 0x1b6   :  { %v176_v20 = vpop.f32.mrb[0].mxu1 }
 0x1b7   :  { %v177_v21 = vadd.f32 %v269_v19, %v176_v20  ;;  %v308_v22 = vpop.f32.mrb[1].mxu1 }
 0x1b8   :  { %v179_v23 = vpop.f32.mrb[2].mxu1 }
 0x1b9   :  { %v182_v24 = vmax.f32 %v177_v21, 0.0  ;;  %v309_v25 = vpop.f32.mrb[3].mxu1 }
 0x1bb   :  { %v183_v26 = vpack.c.bf16 %v182_v24, %v182_v24 }
 0x1bd   :  { %315 = vmatmul.mubr.msk.bf16.vlgmr.msra.gmra.mrb[4].mxu0 %vm53_vm1, %v183_v26 }
 0x290   :  { %v244_v28 = vpop.f32.mrb[4].mxu0 }
 0x291   :  { %v245_v29 = vadd.f32 %v275_v27, %v244_v28  ;;  %v316_v30 = vpop.f32.mrb[5].mxu0 }
 0x292   :  { %v247_v31 = vpop.f32.mrb[6].mxu0 }
 0x293   :  { %250 = vst [vmem:[#allocation2] sm:$0xff] %v245_v29  ;;  %v317_v32 = vpop.f32.mrb[7].mxu0 }
 0x294   :  { %340 = shalt.err (!%p337_p4)
}
 0x295   :  { %s341_s6 = scalar_lea.hbm %s456_s7, 128 }
 0x296   :  { %p342_p5 = scmp.ne.s32.totalorder %s456_s7, %s341_s6  ;;  %p345_p6 = scmp.lt.u32.totalorder %s341_s6, %s456_s7 }
 0x298   :  { %p347_p7 = pnand %p345_p6, %p342_p5 }
 0x29a   :  { %350 = shalt.err (!%p347_p7)
}
 0x29b   :  { %260 = dma.vmem_to_hbm [thread:$0]  %s258_s5, 128, %s456_s7, [#allocation3]  }
 0x29c   :  { %351 = dma.done.wait [#allocation3], 128  }
 0x29d   :  { %352 = vsyncadd [#allocation3], 4294967168 }
 0x29e   :  { %264 = vsyncpa [#allocation3], 1 }

// kernel: tpu_custom_call.1
= control target key start
LH: loop header
LB: loop body
LE: loop exit
PB: predicated region body
PF: predicated region fallthrough
CT: control target
= control target key end

     0   :  { %v353_v1 = vmov 0.0   ;;  %vm354_vm0 = vmmov 0   ;;  %vm53_vm1 = vcmask 261120   ;;  %s449_s0 = inlined_call_operand.vmem [shape: f32[8,32], index: 0, kind: input, shape index: {}]   ;;  %s450_s1 = inlined_call_operand.vmem [shape: bf16[32,64], index: 1, kind: input, shape index: {}]   ;;  %s451_s2 = inlined_call_operand.vmem [shape: f32[1,64], index: 2, kind: input, shape index: {}]   ;;  %s452_s3 = inlined_call_operand.vmem [shape: bf16[64,32], index: 3, kind: input, shape index: {}]   ;;  %s453_s4 = inlined_call_operand.vmem [shape: f32[1,32], index: 4, kind: input, shape index: {}]   ;;  %s454_s5 = inlined_call_operand.vmem [shape: bf16[32,128], index: 5, kind: input, shape index: {}]   ;;  %s455_s6 = inlined_call_operand.vmem [shape: f32[1,128], index: 6, kind: input, shape index: {}]   ;;  %s456_s7 = inlined_call_operand.hbm [shape: f32[8,128], index: 7, kind: output, shape index: {}]  }
   0x1   :  { %v321_v0 = vld [vmem:[%s450_s1] sm:$0xff]   ;;  %290 = vmatprep.subr.bf16.mxu0 %v353_v1  ;;  %v322_v2 = vld [vmem:[%s450_s1 + $0x8] sm:$0xff]   ;;  %298 = vmatprep.subr.bf16.mxu1 %v353_v1 }
   0x2   :  { %291 = vmatpush3.bf16.msra.mxu0 %v321_v0  ;;  %294 = vmatprep.mubr.msk.bf16.mxu0 %vm354_vm0, %v353_v1  ;;  %v28_v3 = vld [vmem:[%s449_s0] sm:$0xff]  ;;  %v324_v5 = vld [vmem:[%s452_s3 + $0x8] sm:$0xff]  }
   0x3   :  { %292 = vmatprep.subr.bf16.mxu0 %v353_v1  ;;  %v323_v4 = vld [vmem:[%s452_s3] sm:$0xff]   ;;  %306 = vmatprep.mubr.msk.bf16.mxu1 %vm354_vm0, %v353_v1  ;;  %v29_v6 = vpack.c.bf16 %v28_v3, %v28_v3 }
   0x4   :  { %299 = vmatpush3.bf16.msra.mxu1 %v323_v4 }
   0x5   :  { %300 = vmatprep.subr.bf16.mxu1 %v353_v1 }
   0x6   :  { %293 = vmatpush3.bf16.msra.mxu0 %v322_v2 }
   0x7   :  { %310 = vmatprep.subr.bf16.mxu0 %v353_v1 }
   0x8   :  { %12 = vsyncpa [#allocation3], 0  ;;  %301 = vmatpush3.bf16.msra.mxu1 %v324_v5  ;;  %v325_v7 = vld [vmem:[%s452_s3 + $0x10] sm:$0xff]   ;;  %v326_v8 = vld [vmem:[%s452_s3 + $0x18] sm:$0xff]   ;;  %vm138_vm2 = vcmask 523264   ;;  %s355_s21 = smov [#allocation2]  }
   0x9   :  { %295 = vmatmul.mubr.msk.bf16.vlgmr.msra.gmra.mrb[0].mxu0 %vm53_vm1, %v29_v6  ;;  %302 = vmatprep.subr.bf16.mxu1 %v353_v1  ;;  %v327_v9 = vld [vmem:[%s454_s5] sm:$0xff]   ;;  %v328_v18 = vld [vmem:[%s454_s5 + $0x8] sm:$0xff]   ;;  %s257_s5 = sshll.u32 %s355_s21, 4  ;;  %s258_s5 = int_to_ptr.vmem [resolvable:$true] %s257_s5 }
   0xa   :  { %314 = vmatprep.mubr.msk.bf16.mxu0 %vm354_vm0, %v353_v1  ;;  %311 = vmatpush3.bf16.msra.mxu0 %v327_v9  ;;  %v265_v10 = vld [vmem:[%s451_s2] ss:$0 sm:$0xff]  ;;  %p334_p1 = scmp.lt.s32.totalorder %s258_s5, %s258_s5 }
   0xb   :  { %312 = vmatprep.subr.bf16.mxu0 %v353_v1  ;;  %v269_v19 = vld [vmem:[%s453_s4] ss:$0 sm:$0xff]  ;;  %s329_s4 = scalar_lea.vmem %s258_s5, 128 }
   0xc   :  { %303 = vmatpush3.bf16.msra.mxu1 %v325_v7  ;;  %v275_v27 = vld [vmem:[%s455_s6] ss:$0 sm:$0xff]  ;;  %p330_p0 = scmp.ne.s32.totalorder %s258_s5, %s329_s4  ;;  %p335_p2 = scmp.lt.s32.totalorder %s329_s4, %s329_s4 }
   0xd   :  { %304 = vmatprep.subr.bf16.mxu1 %v353_v1 }
   0xe   :  { %313 = vmatpush3.bf16.msra.mxu0 %v328_v18  ;;  %p336_p3 = por %p335_p2, %p334_p1 }
  0x10   :  { %305 = vmatpush3.bf16.msra.mxu1 %v326_v8  ;;  %p337_p4 = pnand %p336_p3, %p330_p0 }
  0xdc   :  { %v91_v11 = vpop.f32.mrb[0].mxu0 }
  0xdd   :  { %v92_v12 = vadd.f32 %v265_v10, %v91_v11  ;;  %v296_v13 = vpop.f32.mrb[1].mxu0 }
  0xde   :  { %v94_v14 = vpop.f32.mrb[2].mxu0 }
  0xdf   :  { %v97_v15 = vmax.f32 %v92_v12, 0.0  ;;  %v297_v16 = vpop.f32.mrb[3].mxu0 }
  0xe1   :  { %v98_v17 = vpack.c.bf16 %v97_v15, %v97_v15 }
  0xe3   :  { %307 = vmatmul.mubr.msk.bf16.vlgmr.msra.gmra.mrb[0].mxu1 %vm138_vm2, %v98_v17 }
 0x1b6   :  { %v176_v20 = vpop.f32.mrb[0].mxu1 }
 0x1b7   :  { %v177_v21 = vadd.f32 %v269_v19, %v176_v20  ;;  %v308_v22 = vpop.f32.mrb[1].mxu1 }
 0x1b8   :  { %v179_v23 = vpop.f32.mrb[2].mxu1 }
 0x1b9   :  { %v182_v24 = vmax.f32 %v177_v21, 0.0  ;;  %v309_v25 = vpop.f32.mrb[3].mxu1 }
 0x1bb   :  { %v183_v26 = vpack.c.bf16 %v182_v24, %v182_v24 }
 0x1bd   :  { %315 = vmatmul.mubr.msk.bf16.vlgmr.msra.gmra.mrb[4].mxu0 %vm53_vm1, %v183_v26 }
 0x290   :  { %v244_v28 = vpop.f32.mrb[4].mxu0 }
 0x291   :  { %v245_v29 = vadd.f32 %v275_v27, %v244_v28  ;;  %v316_v30 = vpop.f32.mrb[5].mxu0 }
 0x292   :  { %v247_v31 = vpop.f32.mrb[6].mxu0 }
 0x293   :  { %250 = vst [vmem:[#allocation2] sm:$0xff] %v245_v29  ;;  %v317_v32 = vpop.f32.mrb[7].mxu0 }
 0x294   :  { %340 = shalt.err (!%p337_p4)
}
 0x295   :  { %s341_s6 = scalar_lea.hbm %s456_s7, 128 }
 0x296   :  { %p342_p5 = scmp.ne.s32.totalorder %s456_s7, %s341_s6  ;;  %p345_p6 = scmp.lt.u32.totalorder %s341_s6, %s456_s7 }
 0x298   :  { %p347_p7 = pnand %p345_p6, %p342_p5 }
 0x29a   :  { %350 = shalt.err (!%p347_p7)
}
 0x29b   :  { %260 = dma.vmem_to_hbm [thread:$0]  %s258_s5, 128, %s456_s7, [#allocation3]  }
 0x29c   :  { %351 = dma.done.wait [#allocation3], 128  }
 0x29d   :  { %352 = vsyncadd [#allocation3], 4294967168 }
 0x29e   :  { %264 = vsyncpa [#allocation3], 1 }

</bundles_post_ra>
